<compile_context>
chip_gen: v5e
topology: v5e:2x2
jax: 0.10.0
libtpu: 0.0.40
codegen_flags: <defaults>
</compile_context>

<pallas_src>
import functools

import jax
import jax.numpy as jnp
from jax.experimental import pallas as pl
from jax.experimental.pallas import tpu as pltpu


def clip_embedding_kernel(ids_ref, emb_hbm, pos_ref, o_ref, gbuf, sems, *, n_token):
    b = pl.program_id(0)

    # Issue all row-gather DMAs up-front so they overlap each other (gather is DMA-bound).
    copies = []
    for t in range(n_token):                       # static unroll: n_token is a static int
        row = ids_ref[b, t]                        # scalar token id from SMEM
        cp = pltpu.make_async_copy(
            emb_hbm.at[pl.ds(row, 1)],             # (1, D) row of the HBM embedding table
            gbuf.at[pl.ds(t, 1)],                  # (1, D) slot of the VMEM gather buffer
            sems.at[t],
        )
        cp.start()
        copies.append(cp)
    for cp in copies:
        cp.wait()

    # token_embedding(token) + positional_embedding — one lane-dense (T, D) store.
    o_ref[0] = gbuf[...] + pos_ref[...]


def clip_embedding(token_ids, emb_table, pos_emb):
    """token_ids: (B, T) int; emb_table: (V, D); pos_emb: (T, D).  Returns (B, T, D)."""
    B, T = token_ids.shape
    V, D = emb_table.shape
    assert pos_emb.shape == (T, D)

    kernel = functools.partial(clip_embedding_kernel, n_token=T)
    grid_spec = pltpu.PrefetchScalarGridSpec(
        num_scalar_prefetch=1,                     # token ids land in SMEM
        grid=(B,),
        in_specs=[
            pl.BlockSpec(memory_space=pl.ANY),                # embedding table: stays in HBM
            pl.BlockSpec((T, D), lambda b, ids: (0, 0)),      # positional embedding: resident
        ],
        out_specs=pl.BlockSpec((1, T, D), lambda b, ids: (b, 0, 0)),
        scratch_shapes=[
            pltpu.VMEM((T, D), emb_table.dtype),              # gathered embedding rows
            pltpu.SemaphoreType.DMA((T,)),                    # one sem per row-gather DMA
        ],
    )
    return pl.pallas_call(
        kernel,
        out_shape=jax.ShapeDtypeStruct((B, T, D), emb_table.dtype),
        grid_spec=grid_spec,
        compiler_params=pltpu.CompilerParams(
            dimension_semantics=("parallel",),     # batch elements independent → megacore split
        ),
    )(token_ids.astype(jnp.int32), emb_table, pos_emb)


if __name__ == "__main__":
    # Small shapes consistent with the module: batch=2, n_token=8, n_embed=32, n_vocab=256.
    B, T, D, V = 2, 8, 32, 256
    key = jax.random.PRNGKey(0)
    k_ids, k_emb, k_pos = jax.random.split(key, 3)

    token_ids = jax.random.randint(k_ids, (B, T), 0, V, dtype=jnp.int32)
    emb_table = 0.02 * jax.random.normal(k_emb, (V, D), dtype=jnp.float32)
    # The module initializes positional_embedding to zeros; use small random values here so the
    # additive path is actually exercised by the correctness check (semantics are identical).
    pos_emb = 0.02 * jax.random.normal(k_pos, (T, D), dtype=jnp.float32)

    out = clip_embedding(token_ids, emb_table, pos_emb)
    out = jax.block_until_ready(out)

    ref = emb_table[token_ids] + pos_emb[None, :, :]
    assert out.shape == (B, T, D)
    assert jnp.allclose(out, ref, atol=1e-6, rtol=1e-6), "mismatch vs pure-JAX reference"

    print("KERNEL_OK")
</pallas_src>

<mosaic_0001>
module attributes {stable_mosaic.version = 11 : i64} {
  func.func @clip_embedding_kernel(%arg0: i32, %arg1: memref<2x8xi32, #tpu.memory_space<smem>>, %arg2: memref<256x32xf32, #tpu.memory_space<any>>, %arg3: memref<8x32xf32, #tpu.memory_space<vmem>>, %arg4: memref<1x8x32xf32, #tpu.memory_space<vmem>>, %arg5: memref<8x32xf32, #tpu.memory_space<vmem>>, %arg6: memref<8x!tpu.dma_semaphore, #tpu.memory_space<semaphore_mem>>) attributes {dimension_semantics = [#tpu.dimension_semantics<parallel>], iteration_bounds = array<i64: 2>, scalar_prefetch = 1 : i64, scratch_operands = 2 : i64, tpu.core_type = #tpu.core_type<tc>, window_params = [{}, {pipeline_mode = #tpu.pipeline_mode<synchronous>, transform_indices = @transform_1, window_bounds = array<i64: 8, 32>}, {transform_indices = @transform_2, window_bounds = array<i64: 1, 8, 32>}]} {
    %0 = arith.index_cast %arg0 : i32 to index
    %c0 = arith.constant 0 : index
    %1 = memref.load %arg1[%0, %c0] : memref<2x8xi32, #tpu.memory_space<smem>>
    %c0_i32 = arith.constant 0 : i32
    %c0_i32_0 = arith.constant 0 : i32
    %2 = tpu.memref_slice %arg2[%1, %c0_i32_0] : memref<256x32xf32, #tpu.memory_space<any>> -> memref<1x32xf32, #tpu.memory_space<any>>
    %c0_i32_1 = arith.constant 0 : i32
    %c0_i32_2 = arith.constant 0 : i32
    %3 = tpu.memref_slice %arg5[%c0_i32_1, %c0_i32_2] : memref<8x32xf32, #tpu.memory_space<vmem>> -> memref<1x32xf32, #tpu.memory_space<vmem>>
    %4 = tpu.memref_slice %arg6[%c0_i32] : memref<8x!tpu.dma_semaphore, #tpu.memory_space<semaphore_mem>> -> memref<1x!tpu.dma_semaphore, #tpu.memory_space<semaphore_mem>>
    %5 = tpu.memref_squeeze %4 : memref<1x!tpu.dma_semaphore, #tpu.memory_space<semaphore_mem>> -> memref<!tpu.dma_semaphore, #tpu.memory_space<semaphore_mem>>
    tpu.enqueue_dma source(%2 : memref<1x32xf32, #tpu.memory_space<any>>) target(%3 : memref<1x32xf32, #tpu.memory_space<vmem>>) target_semaphore(%5 : memref<!tpu.dma_semaphore, #tpu.memory_space<semaphore_mem>>)
    %6 = arith.index_cast %arg0 : i32 to index
    %c1 = arith.constant 1 : index
    %7 = memref.load %arg1[%6, %c1] : memref<2x8xi32, #tpu.memory_space<smem>>
    %c1_i32 = arith.constant 1 : i32
    %c0_i32_3 = arith.constant 0 : i32
    %8 = tpu.memref_slice %arg2[%7, %c0_i32_3] : memref<256x32xf32, #tpu.memory_space<any>> -> memref<1x32xf32, #tpu.memory_space<any>>
    %c1_i32_4 = arith.constant 1 : i32
    %c0_i32_5 = arith.constant 0 : i32
    %9 = tpu.memref_slice %arg5[%c1_i32_4, %c0_i32_5] : memref<8x32xf32, #tpu.memory_space<vmem>> -> memref<1x32xf32, #tpu.memory_space<vmem>>
    %10 = tpu.memref_slice %arg6[%c1_i32] : memref<8x!tpu.dma_semaphore, #tpu.memory_space<semaphore_mem>> -> memref<1x!tpu.dma_semaphore, #tpu.memory_space<semaphore_mem>>
    %11 = tpu.memref_squeeze %10 : memref<1x!tpu.dma_semaphore, #tpu.memory_space<semaphore_mem>> -> memref<!tpu.dma_semaphore, #tpu.memory_space<semaphore_mem>>
    tpu.enqueue_dma source(%8 : memref<1x32xf32, #tpu.memory_space<any>>) target(%9 : memref<1x32xf32, #tpu.memory_space<vmem>>) target_semaphore(%11 : memref<!tpu.dma_semaphore, #tpu.memory_space<semaphore_mem>>)
    %12 = arith.index_cast %arg0 : i32 to index
    %c2 = arith.constant 2 : index
    %13 = memref.load %arg1[%12, %c2] : memref<2x8xi32, #tpu.memory_space<smem>>
    %c2_i32 = arith.constant 2 : i32
    %c0_i32_6 = arith.constant 0 : i32
    %14 = tpu.memref_slice %arg2[%13, %c0_i32_6] : memref<256x32xf32, #tpu.memory_space<any>> -> memref<1x32xf32, #tpu.memory_space<any>>
    %c2_i32_7 = arith.constant 2 : i32
    %c0_i32_8 = arith.constant 0 : i32
    %15 = tpu.memref_slice %arg5[%c2_i32_7, %c0_i32_8] : memref<8x32xf32, #tpu.memory_space<vmem>> -> memref<1x32xf32, #tpu.memory_space<vmem>>
    %16 = tpu.memref_slice %arg6[%c2_i32] : memref<8x!tpu.dma_semaphore, #tpu.memory_space<semaphore_mem>> -> memref<1x!tpu.dma_semaphore, #tpu.memory_space<semaphore_mem>>
    %17 = tpu.memref_squeeze %16 : memref<1x!tpu.dma_semaphore, #tpu.memory_space<semaphore_mem>> -> memref<!tpu.dma_semaphore, #tpu.memory_space<semaphore_mem>>
    tpu.enqueue_dma source(%14 : memref<1x32xf32, #tpu.memory_space<any>>) target(%15 : memref<1x32xf32, #tpu.memory_space<vmem>>) target_semaphore(%17 : memref<!tpu.dma_semaphore, #tpu.memory_space<semaphore_mem>>)
    %18 = arith.index_cast %arg0 : i32 to index
    %c3 = arith.constant 3 : index
    %19 = memref.load %arg1[%18, %c3] : memref<2x8xi32, #tpu.memory_space<smem>>
    %c3_i32 = arith.constant 3 : i32
    %c0_i32_9 = arith.constant 0 : i32
    %20 = tpu.memref_slice %arg2[%19, %c0_i32_9] : memref<256x32xf32, #tpu.memory_space<any>> -> memref<1x32xf32, #tpu.memory_space<any>>
    %c3_i32_10 = arith.constant 3 : i32
    %c0_i32_11 = arith.constant 0 : i32
    %21 = tpu.memref_slice %arg5[%c3_i32_10, %c0_i32_11] : memref<8x32xf32, #tpu.memory_space<vmem>> -> memref<1x32xf32, #tpu.memory_space<vmem>>
    %22 = tpu.memref_slice %arg6[%c3_i32] : memref<8x!tpu.dma_semaphore, #tpu.memory_space<semaphore_mem>> -> memref<1x!tpu.dma_semaphore, #tpu.memory_space<semaphore_mem>>
    %23 = tpu.memref_squeeze %22 : memref<1x!tpu.dma_semaphore, #tpu.memory_space<semaphore_mem>> -> memref<!tpu.dma_semaphore, #tpu.memory_space<semaphore_mem>>
    tpu.enqueue_dma source(%20 : memref<1x32xf32, #tpu.memory_space<any>>) target(%21 : memref<1x32xf32, #tpu.memory_space<vmem>>) target_semaphore(%23 : memref<!tpu.dma_semaphore, #tpu.memory_space<semaphore_mem>>)
    %24 = arith.index_cast %arg0 : i32 to index
    %c4 = arith.constant 4 : index
    %25 = memref.load %arg1[%24, %c4] : memref<2x8xi32, #tpu.memory_space<smem>>
    %c4_i32 = arith.constant 4 : i32
    %c0_i32_12 = arith.constant 0 : i32
    %26 = tpu.memref_slice %arg2[%25, %c0_i32_12] : memref<256x32xf32, #tpu.memory_space<any>> -> memref<1x32xf32, #tpu.memory_space<any>>
    %c4_i32_13 = arith.constant 4 : i32
    %c0_i32_14 = arith.constant 0 : i32
    %27 = tpu.memref_slice %arg5[%c4_i32_13, %c0_i32_14] : memref<8x32xf32, #tpu.memory_space<vmem>> -> memref<1x32xf32, #tpu.memory_space<vmem>>
    %28 = tpu.memref_slice %arg6[%c4_i32] : memref<8x!tpu.dma_semaphore, #tpu.memory_space<semaphore_mem>> -> memref<1x!tpu.dma_semaphore, #tpu.memory_space<semaphore_mem>>
    %29 = tpu.memref_squeeze %28 : memref<1x!tpu.dma_semaphore, #tpu.memory_space<semaphore_mem>> -> memref<!tpu.dma_semaphore, #tpu.memory_space<semaphore_mem>>
    tpu.enqueue_dma source(%26 : memref<1x32xf32, #tpu.memory_space<any>>) target(%27 : memref<1x32xf32, #tpu.memory_space<vmem>>) target_semaphore(%29 : memref<!tpu.dma_semaphore, #tpu.memory_space<semaphore_mem>>)
    %30 = arith.index_cast %arg0 : i32 to index
    %c5 = arith.constant 5 : index
    %31 = memref.load %arg1[%30, %c5] : memref<2x8xi32, #tpu.memory_space<smem>>
    %c5_i32 = arith.constant 5 : i32
    %c0_i32_15 = arith.constant 0 : i32
    %32 = tpu.memref_slice %arg2[%31, %c0_i32_15] : memref<256x32xf32, #tpu.memory_space<any>> -> memref<1x32xf32, #tpu.memory_space<any>>
    %c5_i32_16 = arith.constant 5 : i32
    %c0_i32_17 = arith.constant 0 : i32
    %33 = tpu.memref_slice %arg5[%c5_i32_16, %c0_i32_17] : memref<8x32xf32, #tpu.memory_space<vmem>> -> memref<1x32xf32, #tpu.memory_space<vmem>>
    %34 = tpu.memref_slice %arg6[%c5_i32] : memref<8x!tpu.dma_semaphore, #tpu.memory_space<semaphore_mem>> -> memref<1x!tpu.dma_semaphore, #tpu.memory_space<semaphore_mem>>
    %35 = tpu.memref_squeeze %34 : memref<1x!tpu.dma_semaphore, #tpu.memory_space<semaphore_mem>> -> memref<!tpu.dma_semaphore, #tpu.memory_space<semaphore_mem>>
    tpu.enqueue_dma source(%32 : memref<1x32xf32, #tpu.memory_space<any>>) target(%33 : memref<1x32xf32, #tpu.memory_space<vmem>>) target_semaphore(%35 : memref<!tpu.dma_semaphore, #tpu.memory_space<semaphore_mem>>)
    %36 = arith.index_cast %arg0 : i32 to index
    %c6 = arith.constant 6 : index
    %37 = memref.load %arg1[%36, %c6] : memref<2x8xi32, #tpu.memory_space<smem>>
    %c6_i32 = arith.constant 6 : i32
    %c0_i32_18 = arith.constant 0 : i32
    %38 = tpu.memref_slice %arg2[%37, %c0_i32_18] : memref<256x32xf32, #tpu.memory_space<any>> -> memref<1x32xf32, #tpu.memory_space<any>>
    %c6_i32_19 = arith.constant 6 : i32
    %c0_i32_20 = arith.constant 0 : i32
    %39 = tpu.memref_slice %arg5[%c6_i32_19, %c0_i32_20] : memref<8x32xf32, #tpu.memory_space<vmem>> -> memref<1x32xf32, #tpu.memory_space<vmem>>
    %40 = tpu.memref_slice %arg6[%c6_i32] : memref<8x!tpu.dma_semaphore, #tpu.memory_space<semaphore_mem>> -> memref<1x!tpu.dma_semaphore, #tpu.memory_space<semaphore_mem>>
    %41 = tpu.memref_squeeze %40 : memref<1x!tpu.dma_semaphore, #tpu.memory_space<semaphore_mem>> -> memref<!tpu.dma_semaphore, #tpu.memory_space<semaphore_mem>>
    tpu.enqueue_dma source(%38 : memref<1x32xf32, #tpu.memory_space<any>>) target(%39 : memref<1x32xf32, #tpu.memory_space<vmem>>) target_semaphore(%41 : memref<!tpu.dma_semaphore, #tpu.memory_space<semaphore_mem>>)
    %42 = arith.index_cast %arg0 : i32 to index
    %c7 = arith.constant 7 : index
    %43 = memref.load %arg1[%42, %c7] : memref<2x8xi32, #tpu.memory_space<smem>>
    %c7_i32 = arith.constant 7 : i32
    %c0_i32_21 = arith.constant 0 : i32
    %44 = tpu.memref_slice %arg2[%43, %c0_i32_21] : memref<256x32xf32, #tpu.memory_space<any>> -> memref<1x32xf32, #tpu.memory_space<any>>
    %c7_i32_22 = arith.constant 7 : i32
    %c0_i32_23 = arith.constant 0 : i32
    %45 = tpu.memref_slice %arg5[%c7_i32_22, %c0_i32_23] : memref<8x32xf32, #tpu.memory_space<vmem>> -> memref<1x32xf32, #tpu.memory_space<vmem>>
    %46 = tpu.memref_slice %arg6[%c7_i32] : memref<8x!tpu.dma_semaphore, #tpu.memory_space<semaphore_mem>> -> memref<1x!tpu.dma_semaphore, #tpu.memory_space<semaphore_mem>>
    %47 = tpu.memref_squeeze %46 : memref<1x!tpu.dma_semaphore, #tpu.memory_space<semaphore_mem>> -> memref<!tpu.dma_semaphore, #tpu.memory_space<semaphore_mem>>
    tpu.enqueue_dma source(%44 : memref<1x32xf32, #tpu.memory_space<any>>) target(%45 : memref<1x32xf32, #tpu.memory_space<vmem>>) target_semaphore(%47 : memref<!tpu.dma_semaphore, #tpu.memory_space<semaphore_mem>>)
    %c0_i32_24 = arith.constant 0 : i32
    %c0_i32_25 = arith.constant 0 : i32
    %48 = tpu.memref_slice %arg2[%1, %c0_i32_25] : memref<256x32xf32, #tpu.memory_space<any>> -> memref<1x32xf32, #tpu.memory_space<any>>
    %c0_i32_26 = arith.constant 0 : i32
    %c0_i32_27 = arith.constant 0 : i32
    %49 = tpu.memref_slice %arg5[%c0_i32_26, %c0_i32_27] : memref<8x32xf32, #tpu.memory_space<vmem>> -> memref<1x32xf32, #tpu.memory_space<vmem>>
    %50 = tpu.memref_slice %arg6[%c0_i32_24] : memref<8x!tpu.dma_semaphore, #tpu.memory_space<semaphore_mem>> -> memref<1x!tpu.dma_semaphore, #tpu.memory_space<semaphore_mem>>
    %51 = tpu.memref_squeeze %50 : memref<1x!tpu.dma_semaphore, #tpu.memory_space<semaphore_mem>> -> memref<!tpu.dma_semaphore, #tpu.memory_space<semaphore_mem>>
    tpu.wait_dma2 semaphore(%51 : memref<!tpu.dma_semaphore, #tpu.memory_space<semaphore_mem>>) src(%48 : memref<1x32xf32, #tpu.memory_space<any>>) dst(%49 : memref<1x32xf32, #tpu.memory_space<vmem>>)
    %c1_i32_28 = arith.constant 1 : i32
    %c0_i32_29 = arith.constant 0 : i32
    %52 = tpu.memref_slice %arg2[%7, %c0_i32_29] : memref<256x32xf32, #tpu.memory_space<any>> -> memref<1x32xf32, #tpu.memory_space<any>>
    %c1_i32_30 = arith.constant 1 : i32
    %c0_i32_31 = arith.constant 0 : i32
    %53 = tpu.memref_slice %arg5[%c1_i32_30, %c0_i32_31] : memref<8x32xf32, #tpu.memory_space<vmem>> -> memref<1x32xf32, #tpu.memory_space<vmem>>
    %54 = tpu.memref_slice %arg6[%c1_i32_28] : memref<8x!tpu.dma_semaphore, #tpu.memory_space<semaphore_mem>> -> memref<1x!tpu.dma_semaphore, #tpu.memory_space<semaphore_mem>>
    %55 = tpu.memref_squeeze %54 : memref<1x!tpu.dma_semaphore, #tpu.memory_space<semaphore_mem>> -> memref<!tpu.dma_semaphore, #tpu.memory_space<semaphore_mem>>
    tpu.wait_dma2 semaphore(%55 : memref<!tpu.dma_semaphore, #tpu.memory_space<semaphore_mem>>) src(%52 : memref<1x32xf32, #tpu.memory_space<any>>) dst(%53 : memref<1x32xf32, #tpu.memory_space<vmem>>)
    %c2_i32_32 = arith.constant 2 : i32
    %c0_i32_33 = arith.constant 0 : i32
    %56 = tpu.memref_slice %arg2[%13, %c0_i32_33] : memref<256x32xf32, #tpu.memory_space<any>> -> memref<1x32xf32, #tpu.memory_space<any>>
    %c2_i32_34 = arith.constant 2 : i32
    %c0_i32_35 = arith.constant 0 : i32
    %57 = tpu.memref_slice %arg5[%c2_i32_34, %c0_i32_35] : memref<8x32xf32, #tpu.memory_space<vmem>> -> memref<1x32xf32, #tpu.memory_space<vmem>>
    %58 = tpu.memref_slice %arg6[%c2_i32_32] : memref<8x!tpu.dma_semaphore, #tpu.memory_space<semaphore_mem>> -> memref<1x!tpu.dma_semaphore, #tpu.memory_space<semaphore_mem>>
    %59 = tpu.memref_squeeze %58 : memref<1x!tpu.dma_semaphore, #tpu.memory_space<semaphore_mem>> -> memref<!tpu.dma_semaphore, #tpu.memory_space<semaphore_mem>>
    tpu.wait_dma2 semaphore(%59 : memref<!tpu.dma_semaphore, #tpu.memory_space<semaphore_mem>>) src(%56 : memref<1x32xf32, #tpu.memory_space<any>>) dst(%57 : memref<1x32xf32, #tpu.memory_space<vmem>>)
    %c3_i32_36 = arith.constant 3 : i32
    %c0_i32_37 = arith.constant 0 : i32
    %60 = tpu.memref_slice %arg2[%19, %c0_i32_37] : memref<256x32xf32, #tpu.memory_space<any>> -> memref<1x32xf32, #tpu.memory_space<any>>
    %c3_i32_38 = arith.constant 3 : i32
    %c0_i32_39 = arith.constant 0 : i32
    %61 = tpu.memref_slice %arg5[%c3_i32_38, %c0_i32_39] : memref<8x32xf32, #tpu.memory_space<vmem>> -> memref<1x32xf32, #tpu.memory_space<vmem>>
    %62 = tpu.memref_slice %arg6[%c3_i32_36] : memref<8x!tpu.dma_semaphore, #tpu.memory_space<semaphore_mem>> -> memref<1x!tpu.dma_semaphore, #tpu.memory_space<semaphore_mem>>
    %63 = tpu.memref_squeeze %62 : memref<1x!tpu.dma_semaphore, #tpu.memory_space<semaphore_mem>> -> memref<!tpu.dma_semaphore, #tpu.memory_space<semaphore_mem>>
    tpu.wait_dma2 semaphore(%63 : memref<!tpu.dma_semaphore, #tpu.memory_space<semaphore_mem>>) src(%60 : memref<1x32xf32, #tpu.memory_space<any>>) dst(%61 : memref<1x32xf32, #tpu.memory_space<vmem>>)
    %c4_i32_40 = arith.constant 4 : i32
    %c0_i32_41 = arith.constant 0 : i32
    %64 = tpu.memref_slice %arg2[%25, %c0_i32_41] : memref<256x32xf32, #tpu.memory_space<any>> -> memref<1x32xf32, #tpu.memory_space<any>>
    %c4_i32_42 = arith.constant 4 : i32
    %c0_i32_43 = arith.constant 0 : i32
    %65 = tpu.memref_slice %arg5[%c4_i32_42, %c0_i32_43] : memref<8x32xf32, #tpu.memory_space<vmem>> -> memref<1x32xf32, #tpu.memory_space<vmem>>
    %66 = tpu.memref_slice %arg6[%c4_i32_40] : memref<8x!tpu.dma_semaphore, #tpu.memory_space<semaphore_mem>> -> memref<1x!tpu.dma_semaphore, #tpu.memory_space<semaphore_mem>>
    %67 = tpu.memref_squeeze %66 : memref<1x!tpu.dma_semaphore, #tpu.memory_space<semaphore_mem>> -> memref<!tpu.dma_semaphore, #tpu.memory_space<semaphore_mem>>
    tpu.wait_dma2 semaphore(%67 : memref<!tpu.dma_semaphore, #tpu.memory_space<semaphore_mem>>) src(%64 : memref<1x32xf32, #tpu.memory_space<any>>) dst(%65 : memref<1x32xf32, #tpu.memory_space<vmem>>)
    %c5_i32_44 = arith.constant 5 : i32
    %c0_i32_45 = arith.constant 0 : i32
    %68 = tpu.memref_slice %arg2[%31, %c0_i32_45] : memref<256x32xf32, #tpu.memory_space<any>> -> memref<1x32xf32, #tpu.memory_space<any>>
    %c5_i32_46 = arith.constant 5 : i32
    %c0_i32_47 = arith.constant 0 : i32
    %69 = tpu.memref_slice %arg5[%c5_i32_46, %c0_i32_47] : memref<8x32xf32, #tpu.memory_space<vmem>> -> memref<1x32xf32, #tpu.memory_space<vmem>>
    %70 = tpu.memref_slice %arg6[%c5_i32_44] : memref<8x!tpu.dma_semaphore, #tpu.memory_space<semaphore_mem>> -> memref<1x!tpu.dma_semaphore, #tpu.memory_space<semaphore_mem>>
    %71 = tpu.memref_squeeze %70 : memref<1x!tpu.dma_semaphore, #tpu.memory_space<semaphore_mem>> -> memref<!tpu.dma_semaphore, #tpu.memory_space<semaphore_mem>>
    tpu.wait_dma2 semaphore(%71 : memref<!tpu.dma_semaphore, #tpu.memory_space<semaphore_mem>>) src(%68 : memref<1x32xf32, #tpu.memory_space<any>>) dst(%69 : memref<1x32xf32, #tpu.memory_space<vmem>>)
    %c6_i32_48 = arith.constant 6 : i32
    %c0_i32_49 = arith.constant 0 : i32
    %72 = tpu.memref_slice %arg2[%37, %c0_i32_49] : memref<256x32xf32, #tpu.memory_space<any>> -> memref<1x32xf32, #tpu.memory_space<any>>
    %c6_i32_50 = arith.constant 6 : i32
    %c0_i32_51 = arith.constant 0 : i32
    %73 = tpu.memref_slice %arg5[%c6_i32_50, %c0_i32_51] : memref<8x32xf32, #tpu.memory_space<vmem>> -> memref<1x32xf32, #tpu.memory_space<vmem>>
    %74 = tpu.memref_slice %arg6[%c6_i32_48] : memref<8x!tpu.dma_semaphore, #tpu.memory_space<semaphore_mem>> -> memref<1x!tpu.dma_semaphore, #tpu.memory_space<semaphore_mem>>
    %75 = tpu.memref_squeeze %74 : memref<1x!tpu.dma_semaphore, #tpu.memory_space<semaphore_mem>> -> memref<!tpu.dma_semaphore, #tpu.memory_space<semaphore_mem>>
    tpu.wait_dma2 semaphore(%75 : memref<!tpu.dma_semaphore, #tpu.memory_space<semaphore_mem>>) src(%72 : memref<1x32xf32, #tpu.memory_space<any>>) dst(%73 : memref<1x32xf32, #tpu.memory_space<vmem>>)
    %c7_i32_52 = arith.constant 7 : i32
    %c0_i32_53 = arith.constant 0 : i32
    %76 = tpu.memref_slice %arg2[%43, %c0_i32_53] : memref<256x32xf32, #tpu.memory_space<any>> -> memref<1x32xf32, #tpu.memory_space<any>>
    %c7_i32_54 = arith.constant 7 : i32
    %c0_i32_55 = arith.constant 0 : i32
    %77 = tpu.memref_slice %arg5[%c7_i32_54, %c0_i32_55] : memref<8x32xf32, #tpu.memory_space<vmem>> -> memref<1x32xf32, #tpu.memory_space<vmem>>
    %78 = tpu.memref_slice %arg6[%c7_i32_52] : memref<8x!tpu.dma_semaphore, #tpu.memory_space<semaphore_mem>> -> memref<1x!tpu.dma_semaphore, #tpu.memory_space<semaphore_mem>>
    %79 = tpu.memref_squeeze %78 : memref<1x!tpu.dma_semaphore, #tpu.memory_space<semaphore_mem>> -> memref<!tpu.dma_semaphore, #tpu.memory_space<semaphore_mem>>
    tpu.wait_dma2 semaphore(%79 : memref<!tpu.dma_semaphore, #tpu.memory_space<semaphore_mem>>) src(%76 : memref<1x32xf32, #tpu.memory_space<any>>) dst(%77 : memref<1x32xf32, #tpu.memory_space<vmem>>)
    %c0_56 = arith.constant 0 : index
    %c0_57 = arith.constant 0 : index
    %80 = vector.load %arg5[%c0_56, %c0_57] : memref<8x32xf32, #tpu.memory_space<vmem>>, vector<8x32xf32>
    %c0_58 = arith.constant 0 : index
    %c0_59 = arith.constant 0 : index
    %81 = vector.load %arg3[%c0_58, %c0_59] : memref<8x32xf32, #tpu.memory_space<vmem>>, vector<8x32xf32>
    %82 = arith.addf %80, %81 : vector<8x32xf32>
    %c0_60 = arith.constant 0 : index
    %c0_61 = arith.constant 0 : index
    %c0_62 = arith.constant 0 : index
    %83 = vector.load %arg4[%c0_60, %c0_61, %c0_62] : memref<1x8x32xf32, #tpu.memory_space<vmem>>, vector<1x8x32xf32>
    %84 = vector.shape_cast %83 : vector<1x8x32xf32> to vector<8x32xf32>
    %85 = vector.shape_cast %82 : vector<8x32xf32> to vector<1x8x32xf32>
    tpu.vector_store %arg4[%c0_60, %c0_61, %c0_62], %85 {strides = array<i32>} : memref<1x8x32xf32, #tpu.memory_space<vmem>>, vector<1x8x32xf32>,
    return
  }
  func.func @transform_1(%arg0: i32, %arg1: memref<2x8xi32, #tpu.memory_space<smem>>) -> (i32, i32) {
    %c0_i32 = arith.constant 0 : i32
    %c0_i32_0 = arith.constant 0 : i32
    %c0_i32_1 = arith.constant 0 : i32
    return %c0_i32, %c0_i32_0 : i32, i32
  }
  func.func @transform_2(%arg0: i32, %arg1: memref<2x8xi32, #tpu.memory_space<smem>>) -> (i32, i32, i32) {
    %c0_i32 = arith.constant 0 : i32
    %c0_i32_0 = arith.constant 0 : i32
    %c0_i32_1 = arith.constant 0 : i32
    return %arg0, %c0_i32, %c0_i32_0 : i32, i32, i32
  }
}

</mosaic_0001>

<bundles_post_ra>
// kernel: tpu_custom_call.1
= control target key start
LH: loop header
LB: loop body
LE: loop exit
PB: predicated region body
PF: predicated region fallthrough
CT: control target
= control target key end

     0   :  { %s746_s15 = smov [#allocation5]   ;;  %s899_s0 = inlined_call_operand.vmem [shape: s32[2,8], index: 0, kind: input, shape index: {}]   ;;  %s900_s1 = inlined_call_operand.vmem [shape: f32[256,32], index: 1, kind: input, shape index: {}]   ;;  %s901_s2 = inlined_call_operand.vmem [shape: f32[8,32], index: 2, kind: input, shape index: {}]   ;;  %s902_s3 = inlined_call_operand.hbm [shape: f32[2,8,32], index: 3, kind: output, shape index: {}]  }
   0x1   :  { %s9_s14 = sshll.u32 %s899_s0, 4  ;;  %s10_s14 = int_to_ptr.vmem [resolvable:$true] %s9_s14 }
   0x2   :  { %12 = dma.vmem_to_smem %s10_s14, 32, %s746_s15, [#allocation4] }
   0x3   :  { %708 = dma.done.wait [#allocation4], 32 }
   0x4   :  { %709 = vsyncadd [#allocation4], 4294967264 }
   0x5   :  { %15 = sfence }
   0x6   :  { %16 = vsyncpa [#allocation7], 0 }
   0x7   :  { %18 = vsyncpa [#allocation7 + $0x1], 0  ;;  %s770_s16 = smov 0   ;;  %s772_s17 = smov 0  }
   0x8   :  { %s774_s18 = smov 0   ;;  %s776_s19 = smov 0  }
   0x9 LB: > { %s791_s0 = sadd.s32 4294967295, %s744_s19   ;;  %s595_s20 = sadd.s32 4294967294, %s744_s19   ;;  %s744_s19 = sphi %s776_s19, %s908_s19   ;;  %s740_s18 = sphi %s774_s18, %s907_s18   ;;  %s736_s17 = sphi %s772_s17, %s906_s17   ;;  %s732_s16 = sphi %s770_s16, %s905_s16  }
   0xa   : > { %s795_s21 = sadd.s32 1, %s744_s19   ;;  %s52_s22 = sadd.s32 1, %s740_s18 }
   0xb   : > { %s49_s23 = ssub.s32 %s744_s19, %s795_s21  ;;  %p62_p0 = scmp.ne.s32.totalorder %s740_s18, %s736_s17 }
   0xc   : > { %p50_p1 = scmp.eq.s32.totalorder %s49_s23, 0  ;;  %p63_p2 = scmp.eq.s32.totalorder %s791_s0, 1 }
   0xd   : > { %p68_p3 = scmp.ne.s32.totalorder %s736_s17, %s732_s16  ;;  %p69_p4 = scmp.eq.s32.totalorder %s595_s20, 1 }
   0xe   : > { %s806_s24 = scalar_select %p50_p1, %s740_s18, %s52_s22  }
   0xf   : > { %p808_p5 = por %p63_p2, %p62_p0  ;;  %p812_p6 = por %p69_p4, %p68_p3 }
  0x10   : > { %p597_p7 = scmp.ge.s32.totalorder %s744_s19, 1  ;;  %p90_p8 = scmp.lt.s32.totalorder %s744_s19, 3 }
  0x12   : > { %p91_p9 = pnand %p597_p7, %p90_p8 }
  0x13   : > { %s102_s27 = sand.u32 (!%p91_p9), 1, %s736_s17   ;;  %s820_s28 = sshll.u32 (!%p91_p9), %s791_s0, 7 }
  0x14   : > { %94 = sbr.rel (%p91_p9) target bundleno = 131 (0x83), region = 24  ;;  %s824_s29 = sshll.u32 (!%p91_p9), %s102_s27, 3 }
  0x15   : > { %s106_s30 = sld [smem:[#allocation5 + %s820_s28]] (!%p91_p9)  ;;  %s104_s7 = scalar_lea.vmem (!%p91_p9), [#allocation6], %s824_s29 }
  0x1b   : > { %s107_s6 = scalar_lea.vmem %s900_s1, %s106_s30 }
  0x1c   : > { %v122_v0 = vld [vmem:[%s107_s6] sm:$0x1] }
  0x1d   : > { %123 = vst [vmem:[#allocation2] sm:$0x1] %v122_v0 }
  0x1e   : > { %141 = vsyncadd [#allocation3], 16  ;;  %s142_s8 = sadd.s32 1, %s820_s28 }
  0x1f   : > { %s143_s9 = sld [smem:[#allocation5 + %s142_s8]] }
  0x25   : > { %s144_s12 = scalar_lea.vmem %s900_s1, %s143_s9 }
  0x26   : > { %v161_v1 = vld [vmem:[%s144_s12] sm:$0x1] }
  0x27   : > { %162 = vst [vmem:[#allocation2 + $0x1] sm:$0x1] %v161_v1 }
  0x28   : > { %180 = vsyncadd [#allocation3 + $0x1], 16  ;;  %s181_s13 = sadd.s32 2, %s820_s28 }
  0x29   : > { %s182_s14 = sld [smem:[#allocation5 + %s181_s13]] }
  0x2f   : > { %s183_s22 = scalar_lea.vmem %s900_s1, %s182_s14 }
  0x30   : > { %v200_v2 = vld [vmem:[%s183_s22] sm:$0x1] }
  0x31   : > { %201 = vst [vmem:[#allocation2 + $0x2] sm:$0x1] %v200_v2 }
  0x32   : > { %219 = vsyncadd [#allocation3 + $0x2], 16  ;;  %s220_s23 = sadd.s32 3, %s820_s28 }
  0x33   : > { %s221_s30 = sld [smem:[#allocation5 + %s220_s23]] }
  0x39   : > { %s222_s6 = scalar_lea.vmem %s900_s1, %s221_s30 }
  0x3a   : > { %v239_v3 = vld [vmem:[%s222_s6] sm:$0x1] }
  0x3b   : > { %240 = vst [vmem:[#allocation2 + $0x3] sm:$0x1] %v239_v3 }
  0x3c   : > { %258 = vsyncadd [#allocation3 + $0x3], 16  ;;  %s259_s8 = sadd.s32 4, %s820_s28 }
  0x3d   : > { %s260_s9 = sld [smem:[#allocation5 + %s259_s8]] }
  0x43   : > { %s261_s12 = scalar_lea.vmem %s900_s1, %s260_s9 }
  0x44   : > { %v278_v4 = vld [vmem:[%s261_s12] sm:$0x1] }
  0x45   : > { %279 = vst [vmem:[#allocation2 + $0x4] sm:$0x1] %v278_v4 }
  0x46   : > { %297 = vsyncadd [#allocation3 + $0x4], 16  ;;  %s298_s13 = sadd.s32 5, %s820_s28 }
  0x47   : > { %s299_s14 = sld [smem:[#allocation5 + %s298_s13]] }
  0x4d   : > { %s300_s22 = scalar_lea.vmem %s900_s1, %s299_s14 }
  0x4e   : > { %v317_v5 = vld [vmem:[%s300_s22] sm:$0x1] }
  0x4f   : > { %318 = vst [vmem:[#allocation2 + $0x5] sm:$0x1] %v317_v5 }
  0x50   : > { %336 = vsyncadd [#allocation3 + $0x5], 16  ;;  %s337_s23 = sadd.s32 6, %s820_s28 }
  0x51   : > { %s338_s30 = sld [smem:[#allocation5 + %s337_s23]] }
  0x57   : > { %s339_s6 = scalar_lea.vmem %s900_s1, %s338_s30 }
  0x58   : > { %v356_v6 = vld [vmem:[%s339_s6] sm:$0x1] }
  0x59   : > { %357 = vst [vmem:[#allocation2 + $0x6] sm:$0x1] %v356_v6 }
  0x5a   : > { %375 = vsyncadd [#allocation3 + $0x6], 16  ;;  %s376_s8 = sadd.s32 7, %s820_s28 }
  0x5b   : > { %s377_s9 = sld [smem:[#allocation5 + %s376_s8]] }
  0x61   : > { %s378_s12 = scalar_lea.vmem %s900_s1, %s377_s9 }
  0x62   : > { %v395_v7 = vld [vmem:[%s378_s12] sm:$0x1] }
  0x63   : > { %396 = vst [vmem:[#allocation2 + $0x7] sm:$0x1] %v395_v7 }
  0x64   : > { %414 = vsyncadd [#allocation3 + $0x7], 16 }
  0x65   : > { %710 = dma.done.wait [#allocation3], 16 }
  0x66   : > { %711 = vsyncadd [#allocation3], 4294967280 }
  0x67   : > { %712 = dma.done.wait [#allocation3 + $0x1], 16 }
  0x68   : > { %713 = vsyncadd [#allocation3 + $0x1], 4294967280 }
  0x69   : > { %714 = dma.done.wait [#allocation3 + $0x2], 16 }
  0x6a   : > { %715 = vsyncadd [#allocation3 + $0x2], 4294967280 }
  0x6b   : > { %716 = dma.done.wait [#allocation3 + $0x3], 16 }
  0x6c   : > { %717 = vsyncadd [#allocation3 + $0x3], 4294967280 }
  0x6d   : > { %718 = dma.done.wait [#allocation3 + $0x4], 16 }
  0x6e   : > { %719 = vsyncadd [#allocation3 + $0x4], 4294967280 }
  0x6f   : > { %720 = dma.done.wait [#allocation3 + $0x5], 16 }
  0x70   : > { %721 = vsyncadd [#allocation3 + $0x5], 4294967280 }
  0x71   : > { %722 = dma.done.wait [#allocation3 + $0x6], 16 }
  0x72   : > { %723 = vsyncadd [#allocation3 + $0x6], 4294967280 }
  0x73   : > { %724 = dma.done.wait [#allocation3 + $0x7], 16 }
  0x74   : > { %725 = vsyncadd [#allocation3 + $0x7], 4294967280  ;;  %s601_s28 = sshll.u32 %s791_s0, 3  ;;  %s450_s20 = sshll.u32 %s104_s7, 4  ;;  %v432_v8 = vld [vmem:[#allocation2] sm:$0xff]  ;;  %vm435_vm0 = vcmask 261120   ;;  %s451_s20 = int_to_ptr.vmem [resolvable:$true] %s450_s20 }
  0x75   : > { %s448_s15 = scalar_lea.hbm %s902_s3, %s601_s28  ;;  %v433_v9 = vld [vmem:[%s901_s2] sm:$0xff]  ;;  %s438_s0 = scalar_lea.sflag [#allocation7], %s102_s27 }
  0x76   : > { %s452_s22 = sshll.u32 %s448_s15, 4  ;;  %v434_v10 = vadd.f32 %v433_v9, %v432_v8  ;;  %s684_s9 = scalar_lea.hbm %s902_s3, 16  ;;  %s453_s22 = int_to_ptr.hbm [resolvable:$true] %s452_s22 }
  0x77   : > { %s678_s4 = sshra.s32 %s453_s22, 4  ;;  %s679_s4 = int_to_ptr.hbm [resolvable:$true] %s678_s4 }
  0x78   : > { %436 = vst.msk [vmem:[%s104_s7] sm:$0xff] %vm435_vm0, %v434_v10  ;;  %s680_s5 = scalar_lea.hbm %s679_s4, 8  ;;  %p685_p13 = scmp.lt.s32.totalorder %s679_s4, %s902_s3 }
  0x79   : > { %p681_p10 = scmp.ne.s32.totalorder %s679_s4, %s680_s5  ;;  %p686_p0 = scmp.lt.s32.totalorder %s684_s9, %s680_s5 }
  0x7b   : > { %p682_p11 = pnand %p681_p10, %p808_p5  ;;  %p687_p1 = por %p686_p0, %p685_p13 }
  0x7d   : > { %p683_p12 = pneg %p682_p11 }
  0x7f   : > { %p688_p2 = pnand %p687_p1, %p683_p12 }
  0x81   : > { %691 = shalt.err (!%p688_p2)
}
  0x82   : > { %612 = dma.vmem_to_hbm [thread:$0]  (%p808_p5), %s451_s20, 128, %s453_s22, %s438_s0  }
  0x83 PF: > { %p618_p3 = scmp.ge.s32.totalorder %s744_s19, 2  ;;  %s464_s27 = sand.u32 1, %s732_s16  }
  0x84   : > { %s465_s29 = scalar_lea.sflag [#allocation7], %s464_s27 }
  0x85   : > { %p615_p4 = pnand %p618_p3, %p812_p6 }
  0x87   : > { %p616_p7 = pneg %p615_p4 }
  0x89   : > { %727 = dma.done.wait (%p616_p7), %s465_s29, 128  }
  0x8a   : > { %729 = vsyncadd (%p616_p7), %s465_s29, 4294967168  ;;  %p21_p8 = scmp.ge.s32.totalorder %s795_s21, 4   ;;  %s905_s16 = smov %s736_s17 }
  0x8b   : > { %s906_s17 = smov %s740_s18  ;;  %s907_s18 = smov %s806_s24 }
  0x8c   : > { %s908_s19 = smov %s795_s21  ;;  %23 = sbr.rel (!%p21_p8) target bundleno = 9 (0x9), region = 357 }
  0x91   :  { %471 = vsyncpa [#allocation7], 1 }
  0x92   :  { %473 = vsyncpa [#allocation7 + $0x1], 1 }
  0x93   :  { %474 = vsyncmov [#allocation3] }
  0x96   :  { %s475_s19 = vpop.sfrf %474 }
  0x97   :  { %p604_p5 = scmp.ne.s32.totalorder %s475_s19, 0 }
  0x99   :  { %479 = shalt.err (%p604_p5)  }
  0x9a   :  { %481 = vsyncmov [#allocation3 + $0x1] }
  0x9d   :  { %s482_s25 = vpop.sfrf %481 }
  0x9e   :  { %p605_p6 = scmp.ne.s32.totalorder %s482_s25, 0 }
  0xa0   :  { %486 = shalt.err (%p605_p6)  }
  0xa1   :  { %488 = vsyncmov [#allocation3 + $0x2] }
  0xa4   :  { %s489_s26 = vpop.sfrf %488 }
  0xa5   :  { %p606_p9 = scmp.ne.s32.totalorder %s489_s26, 0 }
  0xa7   :  { %493 = shalt.err (%p606_p9)  }
  0xa8   :  { %495 = vsyncmov [#allocation3 + $0x3] }
  0xab   :  { %s496_s7 = vpop.sfrf %495 }
  0xac   :  { %p607_p10 = scmp.ne.s32.totalorder %s496_s7, 0 }
  0xae   :  { %500 = shalt.err (%p607_p10)  }
  0xaf   :  { %502 = vsyncmov [#allocation3 + $0x4] }
  0xb2   :  { %s503_s21 = vpop.sfrf %502 }
  0xb3   :  { %p608_p11 = scmp.ne.s32.totalorder %s503_s21, 0 }
  0xb5   :  { %507 = shalt.err (%p608_p11)  }
  0xb6   :  { %509 = vsyncmov [#allocation3 + $0x5] }
  0xb9   :  { %s510_s1 = vpop.sfrf %509 }
  0xba   :  { %p609_p12 = scmp.ne.s32.totalorder %s510_s1, 0 }
  0xbc   :  { %514 = shalt.err (%p609_p12)  }
  0xbd   :  { %516 = vsyncmov [#allocation3 + $0x6] }
  0xc0   :  { %s517_s2 = vpop.sfrf %516 }
  0xc1   :  { %p610_p13 = scmp.ne.s32.totalorder %s517_s2, 0 }
  0xc3   :  { %521 = shalt.err (%p610_p13)  }
  0xc4   :  { %523 = vsyncmov [#allocation3 + $0x7] }
  0xc7   :  { %s524_s3 = vpop.sfrf %523 }
  0xc8   :  { %p611_p0 = scmp.ne.s32.totalorder %s524_s3, 0 }
  0xca   :  { %528 = shalt.err (%p611_p0)  }

</bundles_post_ra>
